<compile_context>
chip_gen: v7x
topology: tpu7x:2x2x1
jax: 0.10.0
libtpu: 0.0.40
codegen_flags: <defaults>
</compile_context>

<pallas_src>
import functools

import jax
import jax.numpy as jnp
from jax.experimental import pallas as pl
from jax.experimental.pallas import tpu as pltpu


def _round_up(x, m):
    return -(-x // m) * m


def _vmem_capacity_bytes():
    """Best-effort per-core VMEM capacity query; conservative fallback."""
    try:
        info = pltpu.get_tpu_info()
        cap = getattr(info, "vmem_capacity_bytes", None)
        if cap:
            return int(cap)
    except Exception:
        pass
    return 64 << 20   # v7x-safe conservative default


def _ls_ce_kernel(logit_ref, target_ref, out_ref, *,
                  n_rows, row_tile, ignore_index, confidence, smooth_val,
                  fuse_log_softmax):
    """One grid step: per-class partial loss for a (row_tile, C) slab of rows.

    Writes a (1, 1, C) block where lane c holds
        -(smooth * sum_r lm[r, c] + (conf - smooth) * sum_r hit[r, c])
    for this slab; the cross-lane and cross-block reductions happen outside.
    """
    i = pl.program_id(0)

    x = logit_ref[...]                                    # (TR, C), input dtype
    tgt = target_ref[...]                                 # (TR, 1) int32
    tr, c = x.shape

    # Upcast once; keeps accumulation in f32 (bf16 sums over thousands of rows
    # would lose precision) and is safe on v5e's f32-only VALU. The HBM-byte
    # saving from bf16 inputs is preserved either way.
    xf = x.astype(jnp.float32)

    if fuse_log_softmax:
        # 'transformer' path: fused, numerically-stable log_softmax per row.
        # exp lands on the EUP slot and the lane reductions on the XLU slot,
        # both free under the HBM/VALU bound; avoids a separate full (N, C)
        # read+write log_softmax pass in HBM.
        m = jnp.max(xf, axis=-1, keepdims=True)
        z = jnp.exp(xf - m)
        xf = xf - (m + jnp.log(jnp.sum(z, axis=-1, keepdims=True)))

    # Row validity: in-bounds (ragged last tile) and not the ignore_index.
    row_ids = i * row_tile + jax.lax.broadcasted_iota(jnp.int32, (tr, 1), 0)
    valid = (tgt != ignore_index) & (row_ids < n_rows)    # (TR, 1)

    # Mask once with a select (kills NaN/garbage from padded rows), then only
    # two more per-element ops (compare + select); sums over rows give
    # per-class columns which are combined with the two smoothing scalars.
    lm = jnp.where(valid, xf, 0.0)                        # (TR, C)
    class_ids = jax.lax.broadcasted_iota(jnp.int32, (tr, c), 1)
    hit = jnp.where(class_ids == tgt, lm, 0.0)            # (TR, C)

    col_all = jnp.sum(lm, axis=0, keepdims=True)          # (1, C)
    col_hit = jnp.sum(hit, axis=0, keepdims=True)         # (1, C)
    col = -(smooth_val * col_all + (confidence - smooth_val) * col_hit)
    out_ref[...] = col.reshape(1, 1, c)


def _pick_row_tile(n_rows, n_classes, itemsize, block_bytes):
    """Rows per tile: sized from the VMEM block budget, but never a single
    block — >= 2 blocks keeps the DMA/compute pipeline overlapped and lets both
    v7x TensorCores take work; even block counts are targeted for the 2-TC
    split. Tiles are multiples of 8 rows (sublane tiling)."""
    if n_rows <= 8:
        return n_rows                          # tiny input: one full-dim tile
    c_pad = _round_up(n_classes, 128)
    per_row = c_pad * itemsize + 128 * 4       # logit row + lane-padded target
    budget_rows = max(8, (block_bytes // per_row) // 8 * 8)
    n_blocks = max(2, -(-n_rows // budget_rows))
    if n_blocks % 2:
        n_blocks += 1                          # even block count for 2 cores
    tile = _round_up(-(-n_rows // n_blocks), 8)
    return max(8, min(tile, budget_rows))


def label_smoothed_cross_entropy(logit, target, *, num_classes, ignore_index,
                                 smoothing=0.1, reduction="sum",
                                 architecture="las", row_tile=None):
    """Pallas-backed equivalent of LabelSmoothedCrossEntropyLoss.forward.

    logit:  (N, C) float array (log-probabilities for 'las', raw logits for
            'transformer' — log_softmax is fused into the kernel).
    target: (N,)   int array of class ids.
    Returns a scalar float32 loss.
    """
    assert smoothing > 0.0, "only the label-smoothed path is kernelized"
    # TODO(synk): the smoothing == 0.0 fall-through to F.cross_entropy in the
    # reference module is not kernelized (default config uses smoothing > 0).
    N, C = logit.shape
    assert C == num_classes
    fuse_lsm = architecture.lower() == "transformer"

    itemsize = jnp.dtype(logit.dtype).itemsize
    vmem_cap = _vmem_capacity_bytes()
    # Generation-aware block budget: ~cap/10 per block (double-buffered by the
    # pipeline), clamped to [4, 16] MiB — bigger tiles on v5e/v6e's 128 MiB
    # VMEM, smaller on v7x's 64 MiB per core.
    block_bytes = int(min(max(vmem_cap // 10, 4 << 20), 16 << 20))

    if row_tile is None:
        row_tile = _pick_row_tile(N, C, itemsize, block_bytes)
    n_blocks = pl.cdiv(N, row_tile)

    target2d = target.astype(jnp.int32).reshape(N, 1)
    confidence = 1.0 - smoothing
    smooth_val = smoothing / (num_classes - 1)

    kernel = functools.partial(
        _ls_ce_kernel, n_rows=N, row_tile=row_tile,
        ignore_index=ignore_index, confidence=confidence,
        smooth_val=smooth_val, fuse_log_softmax=fuse_lsm)

    # VMEM request: double-buffered logit + lane-padded target blocks, the tiny
    # double-buffered output blocks, plus slack — capped at 75% of physical
    # VMEM so v7x keeps headroom for compiler scratch / the other core.
    c_pad = _round_up(C, 128)
    r_pad = _round_up(row_tile, 8)
    needed = (2 * (r_pad * c_pad * itemsize + r_pad * 128 * 4)
              + 2 * (8 * c_pad * 4) + (4 << 20))
    cap = max(16 << 20, vmem_cap * 3 // 4)
    vmem_limit = int(min(max(needed, 16 << 20), cap))

    # TODO(synk): for very large vocabularies (C in the 100k+ range) an inner
    # "arbitrary" class-axis grid dimension with a resident accumulator would
    # keep blocks bounded on v7x's 64 MiB VMEM; not needed at these sizes.
    partials = pl.pallas_call(
        kernel,
        out_shape=jax.ShapeDtypeStruct((n_blocks, 1, C), jnp.float32),
        grid_spec=pltpu.PrefetchScalarGridSpec(
            num_scalar_prefetch=0,
            grid=(n_blocks,),
            in_specs=[
                pl.BlockSpec((row_tile, C), lambda i: (i, 0)),
                # target stays a per-step (row_tile, 1) block: one small DMA
                # per step (~1/C of the logit bytes).
                pl.BlockSpec((row_tile, 1), lambda i: (i, 0)),
            ],
            out_specs=pl.BlockSpec((1, 1, C), lambda i: (i, 0, 0)),
        ),
        compiler_params=pltpu.CompilerParams(
            dimension_semantics=("parallel",),
            vmem_limit_bytes=vmem_limit),
    )(logit, target2d)

    # Per-block per-class f32 partials reduced once outside the kernel.
    total = jnp.sum(partials)

    reduction = reduction.lower()
    if reduction == "sum":
        return total
    elif reduction == "mean":
        # torch.mean over the full (N, C) element-wise product.
        return total / jnp.float32(N * C)
    else:
        raise ValueError(f"Unsupported reduction method {reduction}")


def _reference(logit, target, *, num_classes, ignore_index, smoothing,
               reduction, architecture="las"):
    logit = logit.astype(jnp.float32)
    if architecture.lower() == "transformer":
        logit = jax.nn.log_softmax(logit, axis=-1)
    confidence = 1.0 - smoothing
    smooth_val = smoothing / (num_classes - 1)
    onehot = jax.nn.one_hot(target, num_classes, dtype=jnp.float32)
    w = onehot * confidence + (1.0 - onehot) * smooth_val
    valid = (target != ignore_index)[:, None]
    w = jnp.where(valid, w, 0.0)
    prod = -w * logit
    return jnp.sum(prod) if reduction == "sum" else jnp.mean(prod)


if __name__ == "__main__":
    key = jax.random.PRNGKey(0)
    k1, k2 = jax.random.split(key)

    N = 50             # (batch*time) rows — deliberately not a multiple of 8
    num_classes = 128  # vocabulary size (lane-dense class axis)
    ignore_index = 2   # e.g. pad token id
    smoothing = 0.1

    raw = jax.random.normal(k1, (N, num_classes), dtype=jnp.float32)
    logit = jax.nn.log_softmax(raw, axis=-1)     # 'las' expects log-probs
    target = jax.random.randint(k2, (N,), 0, num_classes, dtype=jnp.int32)
    target = target.at[0].set(ignore_index).at[5].set(ignore_index)

    cfg = dict(num_classes=num_classes, ignore_index=ignore_index,
               smoothing=smoothing)

    ref_sum = _reference(logit, target, reduction="sum", **cfg)
    ref_mean = _reference(logit, target, reduction="mean", **cfg)
    ref_tr = _reference(raw, target, reduction="sum",
                        architecture="transformer", **cfg)
    logit_bf16 = logit.astype(jnp.bfloat16)
    ref_bf16 = _reference(logit_bf16, target, reduction="sum", **cfg)

    # 1) auto-picked tile (>=2 blocks, pipelined / core-parallel path)
    loss_sum = label_smoothed_cross_entropy(
        logit, target, reduction="sum", architecture="las", **cfg)
    # 2) forced small tile to exercise the ragged / multi-block path
    loss_sum_tiled = label_smoothed_cross_entropy(
        logit, target, reduction="sum", architecture="las", row_tile=16, **cfg)
    # 3) mean reduction
    loss_mean = label_smoothed_cross_entropy(
        logit, target, reduction="mean", architecture="las", **cfg)
    # 4) 'transformer' path with fused in-kernel log_softmax
    loss_tr = label_smoothed_cross_entropy(
        raw, target, reduction="sum", architecture="transformer", **cfg)
    # 5) bf16 logits (half the HBM bytes; f32 accumulation inside the kernel)
    loss_bf16 = label_smoothed_cross_entropy(
        logit_bf16, target, reduction="sum", architecture="las", **cfg)

    (loss_sum, loss_sum_tiled, loss_mean, loss_tr, loss_bf16) = (
        jax.block_until_ready(
            (loss_sum, loss_sum_tiled, loss_mean, loss_tr, loss_bf16)))

    assert jnp.allclose(loss_sum, ref_sum, rtol=1e-5, atol=1e-4), (loss_sum, ref_sum)
    assert jnp.allclose(loss_sum_tiled, ref_sum, rtol=1e-5, atol=1e-4), (loss_sum_tiled, ref_sum)
    assert jnp.allclose(loss_mean, ref_mean, rtol=1e-5, atol=1e-6), (loss_mean, ref_mean)
    assert jnp.allclose(loss_tr, ref_tr, rtol=1e-5, atol=1e-3), (loss_tr, ref_tr)
    assert jnp.allclose(loss_bf16, ref_bf16, rtol=5e-3, atol=5e-3), (loss_bf16, ref_bf16)

    print("KERNEL_OK")
</pallas_src>

<mosaic_0001>
module attributes {stable_mosaic.version = 11 : i64} {
  func.func @_ls_ce_kernel(%arg0: i32, %arg1: memref<32x128xf32, #tpu.memory_space<vmem>>, %arg2: memref<32x1xi32, #tpu.memory_space<vmem>>, %arg3: memref<1x1x128xf32, #tpu.memory_space<vmem>>) attributes {dimension_semantics = [#tpu.dimension_semantics<parallel>], iteration_bounds = array<i64: 2>, scalar_prefetch = 0 : i64, scratch_operands = 0 : i64, tpu.core_type = #tpu.core_type<tc>, window_params = [{transform_indices = @transform_0, window_bounds = array<i64: 32, 128>}, {transform_indices = @transform_1, window_bounds = array<i64: 32, 1>}, {transform_indices = @transform_2, window_bounds = array<i64: 1, 1, 128>}]} {
    %c0 = arith.constant 0 : index
    %c0_0 = arith.constant 0 : index
    %0 = vector.load %arg1[%c0, %c0_0] : memref<32x128xf32, #tpu.memory_space<vmem>>, vector<32x128xf32>
    %c0_1 = arith.constant 0 : index
    %c0_2 = arith.constant 0 : index
    %1 = vector.load %arg2[%c0_1, %c0_2] : memref<32x1xi32, #tpu.memory_space<vmem>>, vector<32x1xi32>
    %c32_i32 = arith.constant 32 : i32
    %2 = arith.muli %arg0, %c32_i32 : i32
    %3 = tpu.iota {dimensions = array<i32: 0>} : vector<32x1xi32>
    %4 = vector.broadcast %2 : i32 to vector<32x1xi32>
    %5 = arith.addi %4, %3 : vector<32x1xi32>
    %c2_i32 = arith.constant 2 : i32
    %6 = vector.broadcast %c2_i32 : i32 to vector<32x1xi32>
    %7 = arith.cmpi ne, %1, %6 : vector<32x1xi32>
    %c50_i32 = arith.constant 50 : i32
    %8 = vector.broadcast %c50_i32 : i32 to vector<32x1xi32>
    %9 = arith.cmpi slt, %5, %8 : vector<32x1xi32>
    %10 = arith.andi %7, %9 : vector<32x1xi1>
    %cst = arith.constant 0.000000e+00 : f32
    %11 = vector.shape_cast %10 : vector<32x1xi1> to vector<32x1xi1>
    %12 = vector.broadcast %11 : vector<32x1xi1> to vector<32x128xi1>
    %13 = vector.broadcast %cst : f32 to vector<32x128xf32>
    %14 = arith.select %12, %0, %13 : vector<32x128xi1>, vector<32x128xf32>
    %15 = tpu.iota {dimensions = array<i32: 1>} : vector<32x128xi32>
    %16 = vector.broadcast %1 : vector<32x1xi32> to vector<32x128xi32>
    %17 = arith.cmpi eq, %15, %16 : vector<32x128xi32>
    %cst_3 = arith.constant 0.000000e+00 : f32
    %18 = vector.broadcast %cst_3 : f32 to vector<32x128xf32>
    %19 = arith.select %17, %14, %18 : vector<32x128xi1>, vector<32x128xf32>
    %cst_4 = arith.constant dense<0.000000e+00> : vector<128xf32>
    %20 = vector.multi_reduction <add>, %14, %cst_4 [0] : vector<32x128xf32> to vector<128xf32>
    %21 = vector.shape_cast %20 : vector<128xf32> to vector<1x128xf32>
    %cst_5 = arith.constant dense<0.000000e+00> : vector<128xf32>
    %22 = vector.multi_reduction <add>, %19, %cst_5 [0] : vector<32x128xf32> to vector<128xf32>
    %23 = vector.shape_cast %22 : vector<128xf32> to vector<1x128xf32>
    %cst_6 = arith.constant 7.87401571E-4 : f32
    %24 = vector.broadcast %cst_6 : f32 to vector<1x128xf32>
    %25 = arith.mulf %24, %21 : vector<1x128xf32>
    %cst_7 = arith.constant 0.899212599 : f32
    %26 = vector.broadcast %cst_7 : f32 to vector<1x128xf32>
    %27 = arith.mulf %26, %23 : vector<1x128xf32>
    %28 = arith.addf %25, %27 : vector<1x128xf32>
    %cst_8 = arith.constant 0.000000e+00 : f32
    %29 = vector.broadcast %cst_8 : f32 to vector<1x128xf32>
    %30 = arith.subf %29, %28 : vector<1x128xf32>
    %31 = vector.shape_cast %30 : vector<1x128xf32> to vector<1x1x128xf32>
    %c0_9 = arith.constant 0 : index
    %c0_10 = arith.constant 0 : index
    %c0_11 = arith.constant 0 : index
    %32 = vector.load %arg3[%c0_9, %c0_10, %c0_11] : memref<1x1x128xf32, #tpu.memory_space<vmem>>, vector<1x1x128xf32>
    tpu.vector_store %arg3[%c0_9, %c0_10, %c0_11], %31 {strides = array<i32>} : memref<1x1x128xf32, #tpu.memory_space<vmem>>, vector<1x1x128xf32>,
    return
  }
  func.func @transform_0(%arg0: i32) -> (i32, i32) {
    %c0_i32 = arith.constant 0 : i32
    %c0_i32_0 = arith.constant 0 : i32
    return %arg0, %c0_i32 : i32, i32
  }
  func.func @transform_1(%arg0: i32) -> (i32, i32) {
    %c0_i32 = arith.constant 0 : i32
    %c0_i32_0 = arith.constant 0 : i32
    return %arg0, %c0_i32 : i32, i32
  }
  func.func @transform_2(%arg0: i32) -> (i32, i32, i32) {
    %c0_i32 = arith.constant 0 : i32
    %c0_i32_0 = arith.constant 0 : i32
    %c0_i32_1 = arith.constant 0 : i32
    return %arg0, %c0_i32, %c0_i32_0 : i32, i32, i32
  }
}

</mosaic_0001>

<bundles_post_ra>
// kernel: tpu_custom_call.1
= control target key start
LH: loop header
LB: loop body
LE: loop exit
PB: predicated region body
PF: predicated region fallthrough
CT: control target
= control target key end

     0   :  { %7 = vsyncpa [#allocation3], 0  ;;  %s630_s0 = inlined_call_operand.vmem [shape: f32[50,128], index: 0, kind: input, shape index: {}]   ;;  %s631_s1 = inlined_call_operand.vmem [shape: s32[50,1], index: 1, kind: input, shape index: {}]   ;;  %s632_s2 = inlined_call_operand.hbm [shape: f32[2,1,128], index: 2, kind: output, shape index: {}]  }
   0x1   :  { %9 = vsyncpa [#allocation3 + $0x1], 0  ;;  %s520_s9 = smov 0   ;;  %s522_s10 = smov 0  }
   0x2   :  { %s524_s11 = smov 0   ;;  %s526_s12 = smov 0  }
   0x3 LB: > { %s541_s13 = sadd.s32 4294967295, %s501_s12   ;;  %s385_s14 = sadd.s32 4294967294, %s501_s12   ;;  %s501_s12 = sphi %s526_s12, %s638_s12   ;;  %s497_s11 = sphi %s524_s11, %s637_s11   ;;  %s493_s10 = sphi %s522_s10, %s636_s10   ;;  %s489_s9 = sphi %s520_s9, %s635_s9  }
   0x4   : > { %s545_s15 = sadd.s32 1, %s501_s12   ;;  %s74_s16 = sadd.s32 1, %s497_s11 }
   0x5   : > { %s71_s17 = ssub.s32 %s501_s12, %s545_s15  ;;  %p84_p0 = scmp.ne.s32.totalorder %s497_s11, %s493_s10 }
   0x6   : > { %p72_p1 = scmp.eq.s32.totalorder %s71_s17, 0  ;;  %p85_p2 = scmp.eq.s32.totalorder %s541_s13, 1 }
   0x7   : > { %p90_p3 = scmp.ne.s32.totalorder %s493_s10, %s489_s9  ;;  %p91_p4 = scmp.eq.s32.totalorder %s385_s14, 1 }
   0x8   : > { %s556_s18 = scalar_select %p72_p1, %s497_s11, %s74_s16  }
   0x9   : > { %p558_p5 = por %p85_p2, %p84_p0  ;;  %p562_p6 = por %p91_p4, %p90_p3 }
   0xa   : > { %p388_p7 = scmp.ge.s32.totalorder %s501_s12, 1  ;;  %p143_p8 = scmp.lt.s32.totalorder %s501_s12, 3 }
   0xc   : > { %p144_p9 = pnand %p388_p7, %p143_p8 }
   0xd   : > { %s389_s21 = sshll.u32 (!%p144_p9), %s541_s13, 2  ;;  %s393_s22 = sshll.u32 (!%p144_p9), %s541_s13, 5  ;;  %v214_v0 = vlaneseq (!%p144_p9)  ;;  %v503_v1 = vmov (!%p144_p9), 0  }
   0xe   : > { %147 = sbr.rel (%p144_p9) target bundleno = 205 (0xcd), region = 28  ;;  %437 = vset.pattern.permute.xlu1 (!%p144_p9), %v503_v1  ;;  %p182_p10 = scmp.lt.s32.totalorder (!%p144_p9), %s389_s21, 6  ;;  %438 = vset.pattern.permute.xlu0 (!%p144_p9), %v503_v1  ;;  %v219_v2 = vstv (!%p144_p9), %s393_s22 }
   0xf   : > { %v215_v3 = vshrl.u32 (!%p144_p9), %v214_v0, 7  ;;  %v261_v19 = vand.u32 (!%p144_p9), 127, %v214_v0  ;;  %s175_s30 = sand.u32 (!%p144_p9), 1, %s493_s10   ;;  %s394_s3 = sshll.u32 (!%p144_p9), %s541_s13, 4 }
  0x10   : > { %s176_s4 = scalar_lea.vmem (!%p144_p9), [#allocation2], %s175_s30  ;;  %s588_s8 = scalar_lea.hbm (!%p144_p9), %s632_s2, %s394_s3 }
  0x11   : > { %v220_v4 = vadd.s32 (!%p144_p9), %v219_v2, %v215_v3  ;;  %v216_v5 = vadd.s32 (!%p144_p9), 8, %v215_v3  ;;  %v217_v6 = vadd.s32 (!%p144_p9), 16, %v215_v3  ;;  %v218_v9 = vadd.s32 (!%p144_p9), 24, %v215_v3  ;;  %s318_s5 = sshll.u32 (!%p144_p9), %s176_s4, 4  ;;  %s306_s14 = scalar_lea.sflag (!%p144_p9), [#allocation3], %s175_s30  ;;  %s590_s5 = int_to_ptr.vmem [resolvable:$true] %s318_s5 }
  0x12   : > { %s439_s16 = scalar_lea.vmem (!%p144_p9), %s590_s5, 16  ;;  %s504_s13 = smov (!%p144_p9), [#allocation2]  }
  0x13   : > { %vm228_vm0 = vcmp.lt.s32.totalorder (!%p144_p9), %v220_v4, 50  ;;  %v221_v7 = vadd.s32 (!%p144_p9), %v219_v2, %v216_v5  ;;  %v222_v8 = vadd.s32 (!%p144_p9), %v219_v2, %v217_v6  ;;  %v223_v14 = vadd.s32 (!%p144_p9), %v219_v2, %v218_v9  ;;  %p440_p11 = scmp.ne.s32.totalorder (!%p144_p9), %s590_s5, %s439_s16  ;;  %s443_s17 = sshll.u32 (!%p144_p9), %s504_s13, 4  ;;  %s444_s17 = int_to_ptr.vmem [resolvable:$false] %s443_s17 }
  0x14   : > { %p446_p0 = scmp.lt.s32.totalorder (!%p144_p9), %s590_s5, %s444_s17 }
  0x15   : > { %s640_s21 = smov (!%p182_p10, %s389_s21), 6  ;;  %vm229_vm3 = vcmp.lt.s32.totalorder %v221_v7, 50  ;;  %vm230_vm7 = vcmp.lt.s32.totalorder %v222_v8, 50  ;;  %vm231_vm10 = vcmp.lt.s32.totalorder %v223_v14, 50  ;;  %p441_p12 = pnand %p440_p11, %p558_p5 }
  0x16   : > { %s390_s23 = sshll.u32 %s640_s21, 3  ;;  %s445_s21 = scalar_lea.vmem %s444_s17, 32 }
  0x17   : > { %s199_s26 = scalar_lea.vmem %s631_s1, %s390_s23  ;;  %s185_s29 = scalar_lea.vmem %s630_s0, %s390_s23 }
  0x18   : > { %v209_v10 = vld [vmem:[%s199_s26] sm:$0xff]  ;;  %v210_v11 = vld [vmem:[%s199_s26 + $0x8] sm:$0xff]  ;;  %v211_v12 = vld [vmem:[%s199_s26 + $0x10] sm:$0xff]  ;;  %p442_p13 = pneg %p441_p12  ;;  %p447_p1 = scmp.lt.s32.totalorder %s445_s21, %s439_s16 }
  0x19   : > { %263 = vperm.xlu1 %437, %v209_v10   ;;  %vm224_vm1 = vcmp.ne.s32.totalorder %v209_v10, 2  ;;  %vm225_vm2 = vcmp.ne.s32.totalorder %v210_v11, 2  ;;  %vm226_vm6 = vcmp.ne.s32.totalorder %v211_v12, 2  ;;  %v212_v15 = vld [vmem:[%s199_s26 + $0x18] sm:$0xff]  ;;  %v205_v21 = vld [vmem:[%s185_s29] sm:$0xff]  ;;  %v206_v26 = vld [vmem:[%s185_s29 + $0x8] sm:$0xff] }
  0x1a   : > { %vm232_vm4 = vmand %vm224_vm1, %vm228_vm0  ;;  %vm227_vm9 = vcmp.ne.s32.totalorder %v212_v15, 2  ;;  %v207_v31 = vld [vmem:[%s185_s29 + $0x10] sm:$0xff]  ;;  %v208_v38 = vld [vmem:[%s185_s29 + $0x18] sm:$0xff]  ;;  %p448_p2 = por %p447_p1, %p446_p0 }
  0x1b   : > { %v236_v13 = vsel %vm232_vm4, 1, %v503_v1  ;;  %vm233_vm5 = vmand %vm225_vm2, %vm229_vm3 }
  0x1c   : > { %241 = vperm.xlu0 %438, %v236_v13   ;;  %v237_v16 = vsel %vm233_vm5, 1, %v503_v1  ;;  %vm234_vm8 = vmand %vm226_vm6, %vm230_vm7  ;;  %p449_p3 = pnand %p448_p2, %p442_p13 }
  0x1d   : > { %266 = vperm.xlu1 %437, %v210_v11   ;;  %v238_v17 = vsel %vm234_vm8, 1, %v503_v1  ;;  %vm235_vm11 = vmand %vm227_vm9, %vm231_vm10 }
  0x1e   : > { %v239_v18 = vsel %vm235_vm11, 1, %v503_v1 }
  0x20   : > { %244 = vperm.xlu0 %438, %v237_v16  }
  0x21   : > { %269 = vperm.xlu1 %437, %v211_v12  }
  0x24   : > { %247 = vperm.xlu0 %438, %v238_v17  }
  0x25   : > { %272 = vperm.xlu1 %437, %v212_v15  }
  0x28   : > { %250 = vperm.xlu0 %438, %v239_v18  }
  0x98   : > { %v264_v20 = vpop.permute.xlu1 %263 }
  0x99   : > { %vm274_vm12 = vcmp.eq.s32.totalorder %v261_v19, %v264_v20 }
  0x9b   : > { %v242_v22 = vpop.permute.xlu0 %241 }
  0x9c   : > { %vm252_vm13 = vcmp.eq.s32.totalorder %v242_v22, 1  ;;  %v267_v23 = vpop.permute.xlu1 %266 }
  0x9d   : > { %v256_v24 = vsel %vm252_vm13, %v205_v21, 0.0  ;;  %vm275_vm15 = vcmp.eq.s32.totalorder %v261_v19, %v267_v23 }
  0x9e   : > { %v278_v25 = vsel %vm274_vm12, %v256_v24, 0.0 }
  0x9f   : > { %v245_v27 = vpop.permute.xlu0 %244 }
  0xa0   : > { %vm253_vm14 = vcmp.eq.s32.totalorder %v245_v27, 1  ;;  %v270_v28 = vpop.permute.xlu1 %269 }
  0xa1   : > { %v257_v29 = vsel %vm253_vm14, %v206_v26, 0.0  ;;  %vm276_vm1 = vcmp.eq.s32.totalorder %v261_v19, %v270_v28 }
  0xa2   : > { %v279_v30 = vsel %vm275_vm15, %v257_v29, 0.0  ;;  %v282_v35 = vadd.f32 %v257_v29, %v256_v24 }
  0xa3   : > { %v291_v32 = vadd.f32 %v279_v30, %v278_v25  ;;  %v248_v33 = vpop.permute.xlu0 %247 }
  0xa4   : > { %vm254_vm0 = vcmp.eq.s32.totalorder %v248_v33, 1  ;;  %v273_v37 = vpop.permute.xlu1 %272 }
  0xa5   : > { %v258_v34 = vsel %vm254_vm0, %v207_v31, 0.0  ;;  %vm277_vm3 = vcmp.eq.s32.totalorder %v261_v19, %v273_v37 }
  0xa6   : > { %v280_v36 = vsel %vm276_vm1, %v258_v34, 0.0  ;;  %v283_v41 = vadd.f32 %v282_v35, %v258_v34 }
  0xa7   : > { %v292_v39 = vadd.f32 %v291_v32, %v280_v36  ;;  %v251_v40 = vpop.permute.xlu0 %250 }
  0xa8   : > { %vm255_vm2 = vcmp.eq.s32.totalorder %v251_v40, 1 }
  0xa9   : > { %v259_v42 = vsel %vm255_vm2, %v208_v38, 0.0 }
  0xaa   : > { %v281_v43 = vsel %vm277_vm3, %v259_v42, 0.0  ;;  %v284_v44 = vadd.f32 %v283_v41, %v259_v42 }
  0xab   : > { %v293_v45 = vadd.f32 %v292_v39, %v281_v43 }
  0xac   : > { %v285_v46 = vrot.slane %v284_v44, 4 }
  0xad   : > { %v294_v47 = vrot.slane %v293_v45, 4 }
  0xae   : > { %v286_v48 = vadd.f32 %v285_v46, %v284_v44 }
  0xaf   : > { %v295_v49 = vadd.f32 %v294_v47, %v293_v45 }
  0xb0   : > { %v287_v50 = vrot.slane %v286_v48, 2 }
  0xb1   : > { %v296_v51 = vrot.slane %v295_v49, 2 }
  0xb2   : > { %v288_v52 = vadd.f32 %v287_v50, %v286_v48 }
  0xb3   : > { %v297_v53 = vadd.f32 %v296_v51, %v295_v49 }
  0xb4   : > { %v289_v54 = vrot.slane %v288_v52, 1 }
  0xb5   : > { %v298_v55 = vrot.slane %v297_v53, 1 }
  0xb6   : > { %v290_v56 = vadd.f32 %v289_v54, %v288_v52 }
  0xb7   : > { %v299_v57 = vadd.f32 %v298_v55, %v297_v53 }
  0xb8   : > { %v300_v58 = vmul.f32 0.0007874016, %v290_v56 }
  0xb9   : > { %v301_v59 = vmul.f32 0.8992126, %v299_v57 }
  0xbb   : > { %v302_v60 = vadd.f32 %v301_v59, %v300_v58 }
  0xbd   : > { %v303_v61 = vsub.f32 0.0, %v302_v60 }
  0xbf   : > { %304 = vst [vmem:[%s176_s4] sm:$0x1] %v303_v61 }
  0xc0   : > { %452 = shalt.err (!%p449_p3)
}
  0xc1   : > { %s453_s22 = scalar_lea.hbm %s588_s8, 16  ;;  %s457_s25 = scalar_lea.hbm %s632_s2, 32 }
  0xc2   : > { %p454_p4 = scmp.ne.s32.totalorder %s588_s8, %s453_s22  ;;  %p458_p9 = scmp.lt.u32.totalorder %s588_s8, %s632_s2 }
  0xc3   : > { %p459_p10 = scmp.lt.u32.totalorder %s457_s25, %s453_s22  ;;  %p461_p12 = scmp.lt.u32.totalorder %s453_s22, %s588_s8 }
  0xc4   : > { %p455_p7 = pnand %p454_p4, %p558_p5 }
  0xc5   : > { %p460_p11 = por %p459_p10, %p458_p9 }
  0xc6   : > { %p456_p8 = pneg %p455_p7 }
  0xc7   : > { %p462_p13 = por %p461_p12, %p460_p11 }
  0xc9   : > { %p463_p0 = pnand %p462_p13, %p456_p8 }
  0xcb   : > { %466 = shalt.err (!%p463_p0)
}
  0xcc   : > { %397 = dma.vmem_to_hbm [thread:$0]  (%p558_p5), %s590_s5, 16, %s588_s8, %s306_s14  }
  0xcd PF: > { %p403_p1 = scmp.ge.s32.totalorder %s501_s12, 2  ;;  %s330_s28 = sand.u32 1, %s489_s9  }
  0xce   : > { %s331_s29 = scalar_lea.sflag [#allocation3], %s330_s28 }
  0xcf   : > { %p400_p2 = pnand %p403_p1, %p562_p6 }
  0xd1   : > { %484 = dma.done.wait (!%p400_p2), %s331_s29, 16  }
  0xd2   : > { %486 = vsyncadd (!%p400_p2), %s331_s29, 4294967280  ;;  %p12_p3 = scmp.ge.s32.totalorder %s545_s15, 4   ;;  %s635_s9 = smov %s493_s10 }
  0xd3   : > { %s636_s10 = smov %s497_s11  ;;  %s637_s11 = smov %s556_s18 }
  0xd4   : > { %s638_s12 = smov %s545_s15  ;;  %14 = sbr.rel (!%p12_p3) target bundleno = 3 (0x3), region = 66 }
  0xdb   :  { %335 = vsyncpa [#allocation3], 1 }
  0xdc   :  { %337 = vsyncpa [#allocation3 + $0x1], 1 }

</bundles_post_ra>
